<compile_context>
chip_gen: v5e
topology: v5e:2x2
jax: 0.10.0
libtpu: 0.0.40
codegen_flags: <defaults>
</compile_context>

<pallas_src>
import functools
import math

import jax
import jax.numpy as jnp
import numpy as np
from jax.experimental import pallas as pl
from jax.experimental.pallas import tpu as pltpu

LN_EPS = 1e-6


def _round_up(x: int, m: int) -> int:
    return ((x + m - 1) // m) * m


# ------------------------------- kernel --------------------------------------
def layernorm_kernel(x_ref, a_ref, b_ref, o_ref, *, eps: float):
    """PyTorch-module LayerNorm on a (bm, H) tile.

    x_ref: (bm, H) native dtype   a_ref/b_ref: (1, H)   o_ref: (bm, H) native dtype
    """
    x = x_ref[...].astype(jnp.float32)
    n = x.shape[-1]

    mean = jnp.mean(x, axis=-1, keepdims=True)                    # XLU reduce
    diff = x - mean
    # unbiased variance: multiply by constant 1/(n-1) (no full-width divide)
    var_unbiased = jnp.sum(diff * diff, axis=-1, keepdims=True) * (1.0 / (n - 1))
    std = jnp.sqrt(var_unbiased)

    # Exact reciprocal on the (bm, 1) column -> PyTorch-parity numerics.
    inv = 1.0 / (std + eps)

    a = a_ref[...].astype(jnp.float32)
    b = b_ref[...].astype(jnp.float32)
    o_ref[...] = (diff * inv * a + b).astype(o_ref.dtype)


# ------------------------------- wrapper --------------------------------------
def layer_norm(x, a_2, b_2, *, eps: float = LN_EPS, block_rows: int = 1024):
    """LayerNorm over the last axis of `x` (any leading shape), native dtype I/O."""
    orig_shape = x.shape
    H = orig_shape[-1]
    M = math.prod(orig_shape[:-1]) if len(orig_shape) > 1 else 1

    x2 = x.reshape(M, H)                           # no dtype cast outside the kernel
    a2 = a_2.reshape(1, H)
    b2 = b_2.reshape(1, H)

    itemsize = jnp.dtype(x.dtype).itemsize
    # sublane packing multiple: 8 (f32), 16 (bf16), 32 (int8/fp8)
    mult = max(8, 32 // itemsize)

    # ---- tile sizing against a VMEM budget (fits v5e's 16 MiB default scope) ----
    vmem_budget = 12 * 1024 * 1024
    bytes_per_row = 4 * H * itemsize               # 2 buffers x (in + out) per row
    bm_vmem = max(mult, (vmem_budget // max(1, bytes_per_row)) // mult * mult)

    bm = min(block_rows, bm_vmem, _round_up(M, mult))
    # v7x has 2 TensorCores: give the "parallel" grid >= 2 blocks when M allows.
    if M > mult:
        bm = min(bm, _round_up(pl.cdiv(M, 2), mult))
    bm = max(bm, mult)

    grid = (pl.cdiv(M, bm),)                       # ragged last block: Pallas clips

    # explicit scoped-VMEM limit: actual double-buffered usage + headroom
    tile_bytes = 2 * 2 * bm * H * itemsize
    param_bytes = 2 * 2 * H * jnp.dtype(a_2.dtype).itemsize
    vmem_limit = int(1.5 * (tile_bytes + param_bytes)) + (1 << 20)
    vmem_limit = min(max(vmem_limit, 8 << 20), 64 << 20)

    # NOTE: production MCAN hidden sizes (512/1024) keep H a multiple of 128
    # (lane-dense stores). Tiny H (like the demo's 32) is correct but uses
    # masked partial stores.

    out = pl.pallas_call(
        functools.partial(layernorm_kernel, eps=eps),
        out_shape=jax.ShapeDtypeStruct((M, H), x.dtype),
        grid=grid,
        in_specs=[
            pl.BlockSpec((bm, H), lambda i: (i, 0)),   # x rows
            pl.BlockSpec((1, H), lambda i: (0, 0)),    # gamma (resident)
            pl.BlockSpec((1, H), lambda i: (0, 0)),    # beta  (resident)
        ],
        out_specs=pl.BlockSpec((bm, H), lambda i: (i, 0)),
        compiler_params=pltpu.CompilerParams(
            dimension_semantics=("parallel",),         # shard rows across TCs (v7x)
            vmem_limit_bytes=vmem_limit),
    )(x2, a2, b2)

    return out.reshape(orig_shape)


# --------------------------------- main ----------------------------------------
if __name__ == "__main__":
    key = jax.random.PRNGKey(0)
    kx, ka, kb = jax.random.split(key, 3)

    B, S, H = 2, 8, 32
    x = jax.random.normal(kx, (B, S, H), jnp.float32)
    a_2 = 1.0 + 0.1 * jax.random.normal(ka, (H,), jnp.float32)   # gamma
    b_2 = 0.1 * jax.random.normal(kb, (H,), jnp.float32)         # beta

    ln = jax.jit(layer_norm)
    out = ln(x, a_2, b_2)
    jax.block_until_ready(out)

    # Pure-JAX reference with identical PyTorch semantics
    mean = jnp.mean(x, axis=-1, keepdims=True)
    std = jnp.std(x, axis=-1, keepdims=True, ddof=1)             # unbiased
    ref = a_2 * (x - mean) / (std + LN_EPS) + b_2

    assert out.shape == x.shape
    assert out.dtype == x.dtype
    np.testing.assert_allclose(np.asarray(out), np.asarray(ref),
                               rtol=1e-4, atol=1e-4)
    print("KERNEL_OK")
</pallas_src>

<mosaic_0001>
module attributes {stable_mosaic.version = 11 : i64} {
  func.func @layernorm_kernel(%arg0: i32, %arg1: memref<8x32xf32, #tpu.memory_space<vmem>>, %arg2: memref<1x32xf32, #tpu.memory_space<vmem>>, %arg3: memref<1x32xf32, #tpu.memory_space<vmem>>, %arg4: memref<8x32xf32, #tpu.memory_space<vmem>>) attributes {dimension_semantics = [#tpu.dimension_semantics<parallel>], iteration_bounds = array<i64: 2>, scalar_prefetch = 0 : i64, scratch_operands = 0 : i64, tpu.core_type = #tpu.core_type<tc>, window_params = [{transform_indices = @transform_0, window_bounds = array<i64: 8, 32>}, {pipeline_mode = #tpu.pipeline_mode<synchronous>, transform_indices = @transform_1, window_bounds = array<i64: 1, 32>}, {pipeline_mode = #tpu.pipeline_mode<synchronous>, transform_indices = @transform_2, window_bounds = array<i64: 1, 32>}, {transform_indices = @transform_3, window_bounds = array<i64: 8, 32>}]} {
    %c0 = arith.constant 0 : index
    %c0_0 = arith.constant 0 : index
    %0 = vector.load %arg1[%c0, %c0_0] : memref<8x32xf32, #tpu.memory_space<vmem>>, vector<8x32xf32>
    %cst = arith.constant dense<0.000000e+00> : vector<8xf32>
    %1 = vector.multi_reduction <add>, %0, %cst [1] : vector<8x32xf32> to vector<8xf32>
    %2 = vector.shape_cast %1 : vector<8xf32> to vector<8x1xf32>
    %cst_1 = arith.constant 3.200000e+01 : f32
    %3 = vector.broadcast %cst_1 : f32 to vector<8x1xf32>
    %4 = arith.divf %2, %3 : vector<8x1xf32>
    %5 = vector.broadcast %4 : vector<8x1xf32> to vector<8x32xf32>
    %6 = arith.subf %0, %5 : vector<8x32xf32>
    %7 = arith.mulf %6, %6 : vector<8x32xf32>
    %cst_2 = arith.constant dense<0.000000e+00> : vector<8xf32>
    %8 = vector.multi_reduction <add>, %7, %cst_2 [1] : vector<8x32xf32> to vector<8xf32>
    %9 = vector.shape_cast %8 : vector<8xf32> to vector<8x1xf32>
    %cst_3 = arith.constant 0.0322580636 : f32
    %10 = vector.broadcast %cst_3 : f32 to vector<8x1xf32>
    %11 = arith.mulf %9, %10 : vector<8x1xf32>
    %12 = math.sqrt %11 : vector<8x1xf32>
    %cst_4 = arith.constant 9.99999997E-7 : f32
    %13 = vector.broadcast %cst_4 : f32 to vector<8x1xf32>
    %14 = arith.addf %12, %13 : vector<8x1xf32>
    %cst_5 = arith.constant 1.000000e+00 : f32
    %15 = vector.broadcast %cst_5 : f32 to vector<8x1xf32>
    %16 = arith.divf %15, %14 : vector<8x1xf32>
    %c0_6 = arith.constant 0 : index
    %c0_7 = arith.constant 0 : index
    %17 = vector.load %arg2[%c0_6, %c0_7] : memref<1x32xf32, #tpu.memory_space<vmem>>, vector<1x32xf32>
    %c0_8 = arith.constant 0 : index
    %c0_9 = arith.constant 0 : index
    %18 = vector.load %arg3[%c0_8, %c0_9] : memref<1x32xf32, #tpu.memory_space<vmem>>, vector<1x32xf32>
    %19 = vector.broadcast %16 : vector<8x1xf32> to vector<8x32xf32>
    %20 = arith.mulf %6, %19 : vector<8x32xf32>
    %21 = vector.broadcast %17 : vector<1x32xf32> to vector<8x32xf32>
    %22 = arith.mulf %20, %21 : vector<8x32xf32>
    %23 = vector.broadcast %18 : vector<1x32xf32> to vector<8x32xf32>
    %24 = arith.addf %22, %23 : vector<8x32xf32>
    %c0_10 = arith.constant 0 : index
    %c0_11 = arith.constant 0 : index
    %25 = vector.load %arg4[%c0_10, %c0_11] : memref<8x32xf32, #tpu.memory_space<vmem>>, vector<8x32xf32>
    tpu.vector_store %arg4[%c0_10, %c0_11], %24 {strides = array<i32>} : memref<8x32xf32, #tpu.memory_space<vmem>>, vector<8x32xf32>,
    return
  }
  func.func @transform_0(%arg0: i32) -> (i32, i32) {
    %c0_i32 = arith.constant 0 : i32
    %c0_i32_0 = arith.constant 0 : i32
    return %arg0, %c0_i32 : i32, i32
  }
  func.func @transform_1(%arg0: i32) -> (i32, i32) {
    %c0_i32 = arith.constant 0 : i32
    %c0_i32_0 = arith.constant 0 : i32
    %c0_i32_1 = arith.constant 0 : i32
    return %c0_i32, %c0_i32_0 : i32, i32
  }
  func.func @transform_2(%arg0: i32) -> (i32, i32) {
    %c0_i32 = arith.constant 0 : i32
    %c0_i32_0 = arith.constant 0 : i32
    %c0_i32_1 = arith.constant 0 : i32
    return %c0_i32, %c0_i32_0 : i32, i32
  }
  func.func @transform_3(%arg0: i32) -> (i32, i32) {
    %c0_i32 = arith.constant 0 : i32
    %c0_i32_0 = arith.constant 0 : i32
    return %arg0, %c0_i32 : i32, i32
  }
}

</mosaic_0001>

<bundles_post_ra>
// kernel: layer_norm.1
= control target key start
LH: loop header
LB: loop body
LE: loop exit
PB: predicated region body
PF: predicated region fallthrough
CT: control target
= control target key end

     0   :  { %8 = vsyncpa [#allocation3], 0  ;;  %s659_s0 = inlined_call_operand.hbm [shape: f32[16,32], index: 0, kind: input, shape index: {}]   ;;  %s660_s1 = inlined_call_operand.vmem [shape: f32[1,32], index: 1, kind: input, shape index: {}]   ;;  %s661_s2 = inlined_call_operand.vmem [shape: f32[1,32], index: 2, kind: input, shape index: {}]   ;;  %s662_s3 = inlined_call_operand.hbm [shape: f32[16,32], index: 3, kind: output, shape index: {}]  }
   0x1   :  { %10 = vsyncpa [#allocation3 + $0x1], 0 }
   0x2   :  { %11 = vsyncpa [#allocation4], 0 }
   0x3   :  { %13 = vsyncpa [#allocation4 + $0x1], 0  ;;  %s519_s12 = smov 0   ;;  %s521_s13 = smov 0  }
   0x4   :  { %s523_s14 = smov 0   ;;  %s525_s15 = smov 0  }
   0x5 LB: > { %s540_s16 = sadd.s32 4294967295, %s496_s15   ;;  %s333_s17 = sadd.s32 4294967294, %s496_s15   ;;  %s496_s15 = sphi %s525_s15, %s672_s15   ;;  %s492_s14 = sphi %s523_s14, %s671_s14   ;;  %s488_s13 = sphi %s521_s13, %s670_s13   ;;  %s484_s12 = sphi %s519_s12, %s669_s12  }
   0x6   : > { %s544_s18 = sadd.s32 1, %s496_s15   ;;  %s26_s19 = sadd.s32 1, %s492_s14 }
   0x7   : > { %s23_s20 = ssub.s32 %s496_s15, %s544_s18  ;;  %p33_p0 = scmp.ne.s32.totalorder %s492_s14, %s488_s13 }
   0x8   : > { %p24_p1 = scmp.eq.s32.totalorder %s23_s20, 0  ;;  %p34_p2 = scmp.eq.s32.totalorder %s496_s15, 0 }
   0x9   : > { %p39_p3 = scmp.ne.s32.totalorder %s488_s13, %s484_s12  ;;  %p40_p4 = scmp.eq.s32.totalorder %s540_s16, 0 }
   0xa   : > { %s556_s21 = scalar_select %p24_p1, %s492_s14, %s26_s19  }
   0xb   : > { %p558_p5 = por %p34_p2, %p33_p0  ;;  %p562_p6 = por %p40_p4, %p39_p3 }
   0xc   : > { %p105_p7 = scmp.eq.s32.totalorder %s540_s16, 1  ;;  %p111_p8 = scmp.eq.s32.totalorder %s333_s17, 1 }
   0xd   : > { %p357_p10 = scmp.lt.s32.totalorder %s496_s15, 2  ;;  %s137_s26 = sand.u32 1, %s492_s14  }
   0xe   : > { %p569_p11 = por %p105_p7, %p33_p0  ;;  %p573_p12 = por %p111_p8, %p39_p3 }
   0xf   : > { %s337_s27 = sshll.u32 %s496_s15, 3  ;;  %s336_s28 = sshll.u32 %s137_s26, 3 }
  0x10   : > { %s145_s4 = scalar_lea.hbm %s659_s0, %s337_s27  ;;  %s141_s6 = scalar_lea.vmem [#allocation2], %s336_s28 }
  0x11   : > { %s147_s5 = sshll.u32 %s145_s4, 4  ;;  %s149_s7 = sshll.u32 %s141_s6, 4  ;;  %s148_s5 = int_to_ptr.hbm [resolvable:$true] %s147_s5  ;;  %s150_s7 = int_to_ptr.vmem [resolvable:$true] %s149_s7 }
  0x12   : > { %p584_p13 = pnand %p357_p10, %p558_p5  ;;  %p338_p0 = scmp.ge.s32.totalorder %s496_s15, 1 }
  0x13   : > { %p154_p1 = scmp.lt.s32.totalorder %s496_s15, 3  ;;  %s138_s9 = scalar_lea.sflag [#allocation3], %s137_s26 }
  0x14   : > { %s400_s10 = sshra.s32 %s148_s5, 4  ;;  %p404_p3 = pneg %p584_p13  ;;  %s401_s10 = int_to_ptr.hbm [resolvable:$true] %s400_s10 }
  0x15   : > { %s402_s11 = scalar_lea.hbm %s401_s10, 8  ;;  %s407_s20 = scalar_lea.hbm %s659_s0, 16 }
  0x16   : > { %p403_p2 = scmp.ne.s32.totalorder %s401_s10, %s402_s11  ;;  %p408_p5 = scmp.lt.s32.totalorder %s401_s10, %s659_s0 }
  0x17   : > { %p409_p8 = scmp.lt.s32.totalorder %s407_s20, %s402_s11 }
  0x18   : > { %p405_p4 = pnand %p404_p3, %p403_p2 }
  0x19   : > { %p410_p10 = por %p409_p8, %p408_p5 }
  0x1a   : > { %p406_p7 = pneg %p405_p4 }
  0x1c   : > { %p411_p9 = pnand %p410_p10, %p406_p7 }
  0x1e   : > { %414 = shalt.err (!%p411_p9)
}
  0x1f   : > { %352 = dma.hbm_to_vmem [thread:$0]  (!%p584_p13), %s148_s5, 128, %s150_s7, %s138_s9  }
  0x20   : > { %p155_p2 = pnand %p338_p0, %p154_p1 }
  0x21   : > { %s605_s26 = sand.u32 (!%p155_p2), 1, %s488_s13  }
  0x22   : > { %158 = sbr.rel (%p155_p2) target bundleno = 332 (0x14c), region = 32  ;;  %s339_s28 = sshll.u32 (!%p155_p2), %s605_s26, 3 }
  0x23   : > { %s161_s29 = scalar_lea.sflag (!%p155_p2), [#allocation3], %s605_s26  ;;  %s164_s30 = scalar_lea.vmem (!%p155_p2), [#allocation2], %s339_s28 }
  0x27   : > { %475 = dma.done.wait (%p562_p6), %s161_s29, 128  }
  0x28   : > { %477 = vsyncadd (%p562_p6), %s161_s29, 4294967168  ;;  %vm189_vm0 = vcmask 261120   ;;  %v188_v0 = vld [vmem:[%s164_s30] sm:$0xff]  ;;  %v498_v2 = vmov 32.0   ;;  %s342_s23 = sshll.u32 %s540_s16, 3  ;;  %s187_s10 = scalar_lea.vmem [#allocation5], %s339_s28 }
  0x29   : > { %v190_v1 = vsel %vm189_vm0, %v188_v0, 0.0  ;;  %394 = vrcp.f32 %v498_v2  ;;  %v392_v36 = vld [vmem:[%s660_s1] ss:$0 sm:$0xff]  ;;  %s258_s8 = scalar_lea.hbm %s662_s3, %s342_s23  ;;  %s260_s11 = sshll.u32 %s187_s10, 4  ;;  %s261_s11 = int_to_ptr.vmem [resolvable:$true] %s260_s11 }
  0x2a   : > { %191 = vadd.xlane.f32.xlu0 %v190_v1  ;;  %v393_v39 = vld [vmem:[%s661_s2] ss:$0 sm:$0xff]  ;;  %s262_s17 = sshll.u32 %s258_s8, 4  ;;  %s248_s19 = scalar_lea.sflag [#allocation4], %s605_s26  ;;  %s263_s17 = int_to_ptr.hbm [resolvable:$true] %s262_s17 }
  0x2b   : > { %s444_s20 = sshra.s32 %s263_s17, 4  ;;  %s450_s28 = scalar_lea.hbm %s662_s3, 16  ;;  %s445_s20 = int_to_ptr.hbm [resolvable:$true] %s444_s20 }
  0x2c   : > { %s446_s22 = scalar_lea.hbm %s445_s20, 8  ;;  %p451_p0 = scmp.lt.s32.totalorder %s445_s20, %s662_s3 }
  0x2d   : > { %p447_p6 = scmp.ne.s32.totalorder %s445_s20, %s446_s22  ;;  %p452_p1 = scmp.lt.s32.totalorder %s450_s28, %s446_s22 }
  0x2f   : > { %v395_v3 = vpop.eup %394  ;;  %p448_p9 = pnand %p447_p6, %p569_p11  ;;  %p453_p3 = por %p452_p1, %p451_p0 }
  0x30   : > { %v194_v4 = vmul.f32 32.0, %v395_v3  ;;  %vm198_vm1 = vweird.f32 %v395_v3 }
  0x31   : > { %p449_p13 = pneg %p448_p9 }
  0x32   : > { %v195_v5 = vsub.f32 1.0, %v194_v4 }
  0x33   : > { %p454_p4 = pnand %p453_p3, %p449_p13 }
  0x34   : > { %v196_v6 = vmul.f32 %v395_v3, %v195_v5 }
  0x36   : > { %v197_v7 = vadd.f32 %v395_v3, %v196_v6 }
  0x38   : > { %v199_v8 = vsel %vm198_vm1, %v395_v3, %v197_v7 }
  0x9d   : > { %v192_v9 = vpop.xlane.xlu0 %191 }
  0x9e   : > { %v200_v10 = vmul.f32 %v199_v8, %v192_v9 }
  0xa0   : > { %v201_v11 = vsub.f32 %v188_v0, %v200_v10 }
  0xa2   : > { %v202_v12 = vmul.f32 %v201_v11, %v201_v11 }
  0xa4   : > { %v203_v13 = vsel %vm189_vm0, %v202_v12, 0.0 }
  0xa5   : > { %204 = vadd.xlane.f32.xlu0 %v203_v13 }
 0x118   : > { %v205_v14 = vpop.xlane.xlu0 %204 }
 0x119   : > { %v206_v15 = vmul.f32 0.032258064, %v205_v14 }
 0x11b   : > { %396 = vrsqrt.f32 %v206_v15  ;;  %vm214_vm2 = vcmp.eq.f32.partialorder %v206_v15, inf  ;;  %v217_v23 = vand.u32 2147483648, %v206_v15  ;;  %vm216_vm3 = vcmp.eq.f32.partialorder %v206_v15, 0.0 }
 0x121   : > { %v397_v16 = vpop.eup %396 }
 0x122   : > { %v208_v17 = vmul.f32 %v397_v16, %v206_v15 }
 0x124   : > { %v209_v18 = vmul.f32 %v397_v16, %v208_v17 }
 0x126   : > { %v210_v19 = vmul.f32 0.5, %v209_v18 }
 0x128   : > { %v211_v20 = vsub.f32 1.5, %v210_v19 }
 0x12a   : > { %v212_v21 = vmul.f32 %v397_v16, %v211_v20 }
 0x12c   : > { %v213_v22 = vmul.f32 %v212_v21, %v206_v15 }
 0x12e   : > { %v215_v24 = vsel %vm214_vm2, %v206_v15, %v213_v22 }
 0x12f   : > { %v218_v25 = vsel %vm216_vm3, %v217_v23, %v215_v24 }
 0x130   : > { %v219_v26 = vadd.f32 1e-06, %v218_v25 }
 0x132   : > { %398 = vrcp.f32 %v219_v26  ;;  %v231_v30 = vand.u32 2147483648, %v219_v26  ;;  %v229_v32 = vand.u32 2147483647, %v219_v26  ;;  %vm225_vm5 = vweird.f32 %v219_v26 }
 0x134   : > { %v232_v34 = vor.u32 1.1754944e-38, %v231_v30  ;;  %vm230_vm7 = vcmp.eq.f32.partialorder %v229_v32, 8.507059e+37 }
 0x138   : > { %v399_v27 = vpop.eup %398 }
 0x139   : > { %v221_v28 = vmul.f32 %v399_v27, %v219_v26  ;;  %vm226_vm4 = vweird.f32 %v399_v27 }
 0x13a   : > { %vm227_vm6 = vmor %vm225_vm5, %vm226_vm4 }
 0x13b   : > { %v222_v29 = vsub.f32 1.0, %v221_v28 }
 0x13d   : > { %v223_v31 = vmul.f32 %v399_v27, %v222_v29 }
 0x13f   : > { %v224_v33 = vadd.f32 %v399_v27, %v223_v31 }
 0x141   : > { %v228_v35 = vsel %vm227_vm6, %v399_v27, %v224_v33 }
 0x142   : > { %v233_v37 = vsel %vm230_vm7, %v232_v34, %v228_v35 }
 0x143   : > { %v237_v38 = vmul.f32 %v233_v37, %v201_v11 }
 0x145   : > { %v241_v40 = vmul.f32 %v392_v36, %v237_v38 }
 0x147   : > { %v245_v41 = vadd.f32 %v393_v39, %v241_v40 }
 0x149   : > { %246 = vst.msk [vmem:[%s187_s10] sm:$0xff] %vm189_vm0, %v245_v41 }
 0x14a   : > { %457 = shalt.err (!%p454_p4)
}
 0x14b   : > { %347 = dma.vmem_to_hbm [thread:$0]  (%p569_p11), %s261_s11, 128, %s263_s17, %s248_s19  }
 0x14c PF: > { %s274_s26 = sand.u32 1, %s484_s12   ;;  %p668_p7 = scmp.ge.s32.totalorder %s496_s15, 2 }
 0x14d   : > { %s275_s4 = scalar_lea.sflag [#allocation4], %s274_s26 }
 0x14e   : > { %p354_p5 = pnand %p668_p7, %p573_p12 }
 0x150   : > { %p355_p8 = pneg %p354_p5 }
 0x152   : > { %479 = dma.done.wait (%p355_p8), %s275_s4, 128  }
 0x153   : > { %481 = vsyncadd (%p355_p8), %s275_s4, 4294967168  ;;  %p16_p10 = scmp.ge.s32.totalorder %s544_s18, 4   ;;  %s669_s12 = smov %s488_s13 }
 0x154   : > { %s670_s13 = smov %s492_s14  ;;  %s671_s14 = smov %s556_s21 }
 0x155   : > { %s672_s15 = smov %s544_s18  ;;  %18 = sbr.rel (!%p16_p10) target bundleno = 5 (0x5), region = 77 }
 0x15a   :  { %281 = vsyncpa [#allocation3], 1 }
 0x15b   :  { %283 = vsyncpa [#allocation3 + $0x1], 1 }
 0x15c   :  { %284 = vsyncpa [#allocation4], 1 }
 0x15d   :  { %286 = vsyncpa [#allocation4 + $0x1], 1 }

</bundles_post_ra>
